<compile_context>
chip_gen: v7x
topology: tpu7x:2x2x1
jax: 0.10.0
libtpu: 0.0.40
codegen_flags: <defaults>
</compile_context>

<pallas_src>
import functools

import jax
import jax.numpy as jnp
from jax.experimental import pallas as pl
from jax.experimental.pallas import tpu as pltpu

_DEFAULT_FLATTEN = (1, -1)
_PERCENTAGE = 0.99999

_LANES = 128        # vreg lane width
_SUBLANES = 8       # vreg sublane count (f32)
_TILE_CANDIDATES = (4096, 2048, 1024, 512, 256, 128, 64, 32, 16, 8)


# ---------------------------------------------------------------------------
# Chip-dependent sizing (VMEM limit, fused-path threshold, TensorCore count).
# ---------------------------------------------------------------------------
def _tpu_config():
    vmem_cap = 64 * 1024 * 1024          # conservative default (v7x per-TC)
    try:
        info = pltpu.get_tpu_info()
        vmem_cap = int(getattr(info, "vmem_capacity_bytes", vmem_cap))
    except Exception:
        pass
    num_tc = 1
    try:
        kind = jax.devices()[0].device_kind.lower()
        if any(tag in kind for tag in ("7x", "v7", "v4", "v5p")):
            num_tc = 2                    # megacore / dual-TC chips
    except Exception:
        pass
    vmem_limit = min((vmem_cap * 3) // 4, 100 * 1024 * 1024)
    if num_tc > 1:
        # Prefer the 2-TC parallel two-pass path above a few MiB.
        fused_max = 4 * 1024 * 1024
    else:
        # Single TC: fused (1 read + 1 write) pays off as long as in+out fit.
        fused_max = min(int(vmem_limit * 0.4), 48 * 1024 * 1024)
    return {"vmem_limit_bytes": int(vmem_limit),
            "fused_max_bytes": int(fused_max),
            "num_tc": int(num_tc)}


_CFG = _tpu_config()


# ---------------------------------------------------------------------------
# Layout helpers: lane-dense (rows, 128) view, copy-free in the common case.
# ---------------------------------------------------------------------------
def _choose_tile_m(rows, num_tc=1):
    divisors = [tm for tm in _TILE_CANDIDATES if rows % tm == 0]
    if not divisors:
        return None
    if num_tc > 1:
        for tm in divisors:
            if (rows // tm) % num_tc == 0:
                return tm
    return divisors[0]


def _prepare_rows(flat, need_tiling):
    """Return (x2, padded).  Hot path (numel % 128 == 0): pure reshape, no copy."""
    total = flat.shape[0]
    if total % _LANES == 0:
        rows = total // _LANES
        if (not need_tiling) or (_choose_tile_m(rows) is not None):
            return flat.reshape(rows, _LANES), False
    # Rare fallback: edge-pad (repeats last element -> min/max unaffected) to a
    # tileable size; the tail is sliced off afterwards.  Costs one HBM copy.
    chunk = _SUBLANES * _LANES
    pad = (-total) % chunk
    flat = jnp.pad(flat, (0, pad), mode="edge") if pad else flat
    return flat.reshape(-1, _LANES), pad > 0


# ---------------------------------------------------------------------------
# Fused kernel: global min/max + fake-quant in one pass (x resident in VMEM).
# Grid-less pallas_call -> single-buffered in/out, one HBM read + one write.
# ---------------------------------------------------------------------------
def _fused_minmax_quantize_kernel(x_ref, o_ref, mn_ref, mx_ref, *,
                                  qmin, qmax, dequantize):
    x = x_ref[...]
    mn = jnp.min(x, keepdims=True)                       # (1, 1)
    mx = jnp.max(x, keepdims=True)
    scale = jnp.maximum((mx - mn) * (1.0 / (qmax - qmin)), 1e-8)
    inv_scale = 1.0 / scale                               # one reciprocal
    offset_in = qmin * scale - mn
    q = (x + offset_in) * inv_scale                       # multiply, not divide
    q = jnp.round(jnp.clip(q, qmin, qmax))                # clamp then round (== torch)
    if dequantize:
        q = q * scale + (mn - qmin * scale)
    o_ref[...] = q.astype(o_ref.dtype)
    mn_ref[...] = mn
    mx_ref[...] = mx


def _fused_quantize(x2, qmin, qmax, dequantize, inplace):
    r, l = x2.shape
    kernel = functools.partial(_fused_minmax_quantize_kernel,
                               qmin=qmin, qmax=qmax, dequantize=dequantize)
    kwargs = {"input_output_aliases": {0: 0}} if inplace else {}
    q, mn, mx = pl.pallas_call(
        kernel,
        out_shape=(
            jax.ShapeDtypeStruct((r, l), x2.dtype),
            jax.ShapeDtypeStruct((1, 1), jnp.float32),
            jax.ShapeDtypeStruct((1, 1), jnp.float32),
        ),
        compiler_params=pltpu.CompilerParams(
            vmem_limit_bytes=_CFG["vmem_limit_bytes"]),
        **kwargs,
    )(x2)
    return q, mn, mx


# ---------------------------------------------------------------------------
# Pass 1 (large tensors): per-core (8,128) min/max partials accumulated in the
# resident output block (VPU-only elementwise minimum/maximum), grid
# (num_cores, steps) with the outer axis "parallel" (2 TCs on v7x).  The tiny
# final reduce over (num_cores*8, 128) is done in XLA.
# ---------------------------------------------------------------------------
def _partial_minmax_kernel(x_ref, mn_ref, mx_ref):
    t = pl.program_id(1)
    x3 = x_ref[...].reshape(-1, _SUBLANES, _LANES)        # (tile_m/8, 8, 128)
    tile_mn = jnp.min(x3, axis=0)
    tile_mx = jnp.max(x3, axis=0)

    @pl.when(t == 0)
    def _():
        mn_ref[...] = tile_mn
        mx_ref[...] = tile_mx

    @pl.when(t != 0)
    def _():
        mn_ref[...] = jnp.minimum(mn_ref[...], tile_mn)
        mx_ref[...] = jnp.maximum(mx_ref[...], tile_mx)


def _global_min_max(x2, tile_m=None):
    rows, l = x2.shape
    num_tc = _CFG["num_tc"]
    if tile_m is None:
        tile_m = _choose_tile_m(rows, num_tc)
    assert tile_m is not None and rows % tile_m == 0
    num_tiles = rows // tile_m
    cores = num_tc if (num_tiles % num_tc == 0 and num_tiles >= num_tc) else 1
    steps = num_tiles // cores

    pmn, pmx = pl.pallas_call(
        _partial_minmax_kernel,
        out_shape=(
            jax.ShapeDtypeStruct((cores * _SUBLANES, l), jnp.float32),
            jax.ShapeDtypeStruct((cores * _SUBLANES, l), jnp.float32),
        ),
        grid=(cores, steps),
        in_specs=[pl.BlockSpec((tile_m, l), lambda c, t: (c * steps + t, 0))],
        out_specs=(
            pl.BlockSpec((_SUBLANES, l), lambda c, t: (c, 0)),
            pl.BlockSpec((_SUBLANES, l), lambda c, t: (c, 0)),
        ),
        compiler_params=pltpu.CompilerParams(
            dimension_semantics=("parallel", "arbitrary"),
            vmem_limit_bytes=_CFG["vmem_limit_bytes"]),
    )(x2)
    # Tiny final cross-core / cross-lane reduce (<= 2*(8,128) f32) in XLA.
    return jnp.min(pmn), jnp.max(pmx)


# ---------------------------------------------------------------------------
# Pass 2: elementwise uniform fake-quantization with precomputed SMEM scalars.
#   params = [inv_scale, qmin*scale - zero_point, scale, zero_point - qmin*scale]
# ---------------------------------------------------------------------------
def _quantize_kernel(params_ref, x_ref, o_ref, *, qmin, qmax, dequantize):
    inv_scale = params_ref[0]
    offset_in = params_ref[1]
    scale = params_ref[2]
    offset_out = params_ref[3]
    q = (x_ref[...] + offset_in) * inv_scale
    q = jnp.round(jnp.clip(q, qmin, qmax))
    if dequantize:
        q = q * scale + offset_out
    o_ref[...] = q.astype(o_ref.dtype)


def _quantize_tiled(x2, params, *, qmin, qmax, dequantize, inplace, tile_m=None):
    rows, l = x2.shape
    if tile_m is None:
        tile_m = _choose_tile_m(rows, _CFG["num_tc"])
    assert tile_m is not None and rows % tile_m == 0
    num_tiles = rows // tile_m
    kernel = functools.partial(_quantize_kernel, qmin=qmin, qmax=qmax,
                               dequantize=dequantize)
    kwargs = {"input_output_aliases": {1: 0}} if inplace else {}
    return pl.pallas_call(
        kernel,
        out_shape=jax.ShapeDtypeStruct((rows, l), x2.dtype),
        grid=(num_tiles,),
        in_specs=[
            pl.BlockSpec(memory_space=pltpu.MemorySpace.SMEM),   # params (4,)
            pl.BlockSpec((tile_m, l), lambda i: (i, 0)),
        ],
        out_specs=pl.BlockSpec((tile_m, l), lambda i: (i, 0)),
        compiler_params=pltpu.CompilerParams(
            dimension_semantics=("parallel",),
            vmem_limit_bytes=_CFG["vmem_limit_bytes"]),
        **kwargs,
    )(params, x2)


# ---------------------------------------------------------------------------
# QuantMeasure module (JAX/Pallas port of the PyTorch nn.Module forward)
# ---------------------------------------------------------------------------
class QuantMeasure:
    def __init__(self, shape_measure=(1,), flatten_dims=_DEFAULT_FLATTEN,
                 inplace=False, dequantize=True, stochastic=False,
                 momentum=0.9, measure=False):
        # buffers, deterministically initialized (torch.zeros)
        self.running_zero_point = jnp.zeros(shape_measure, jnp.float32)
        self.running_range = jnp.zeros(shape_measure, jnp.float32)
        self.measure = measure
        if self.measure:
            self.num_measured = jnp.zeros((1,), jnp.float32)
        self.flatten_dims = flatten_dims
        self.momentum = momentum
        self.dequantize = dequantize
        self.stochastic = stochastic
        self.inplace = inplace
        self.training = True

    def __call__(self, x, num_bits):
        if self.stochastic:
            # TODO(synk): stochastic rounding (uniform(-0.5,0.5) noise) not wired;
            # would use pltpu.prng_seed + prng_random_bits + stochastic_round.
            raise NotImplementedError("stochastic rounding not supported")

        # UniformQuantize defaults: signed=False
        qmin = 0.0
        qmax = qmin + 2.0 ** num_bits - 1.0

        orig_dtype = x.dtype
        # TODO(synk): native bf16/int8 tiling (16/32-row granularity) not wired;
        # compute in f32 and cast back.
        xf = x if x.dtype == jnp.float32 else x.astype(jnp.float32)
        flat = xf.reshape(-1)
        total = int(flat.shape[0])

        training_stats = self.training or self.measure
        fused = (training_stats and not self.measure
                 and total * 4 <= _CFG["fused_max_bytes"])
        x2, padded = _prepare_rows(flat, need_tiling=not fused)

        q2 = None
        if training_stats:
            # percentile top-k: k = round((1-p)*F + 0.5); at these sizes k == 1,
            # so the k-th smallest/largest per row is the row min/max and
            # reduce_type='extreme' over dim 0 gives the global min/max.
            f = total if x.ndim == 1 else total // int(x.shape[0])
            k = int(round((1.0 - _PERCENTAGE) * f + 0.5))
            if k != 1:
                # TODO(synk): general top-k percentile (k>1) not implemented.
                raise NotImplementedError("percentile top-k with k>1 not supported")

            if fused:
                q2, mn, mx = _fused_quantize(x2, qmin, qmax, self.dequantize,
                                             self.inplace)
                mn = mn[0, 0]
                mx = mx[0, 0]
            else:
                mn, mx = _global_min_max(x2)
            zero_point = mn
            rng = mx - mn

            if self.measure:
                momentum = self.num_measured[0] / (self.num_measured[0] + 1.0)
                self.num_measured = self.num_measured + 1.0
            else:
                momentum = self.momentum
            # buffer update (scalar qparams broadcast to shape_measure); eager only —
            # these attribute mutations are not jit-safe side effects.
            self.running_zero_point = (
                self.running_zero_point * momentum + zero_point * (1.0 - momentum))
            self.running_range = (
                self.running_range * momentum + rng * (1.0 - momentum))
        else:
            rng = self.running_range.reshape(-1)[0]
            zero_point = self.running_zero_point.reshape(-1)[0]

        if self.measure:
            return x

        if q2 is None:
            scale = jnp.maximum(rng * (1.0 / (qmax - qmin)), 1e-8)
            params = jnp.stack([
                1.0 / scale,
                qmin * scale - zero_point,
                scale,
                zero_point - qmin * scale,
            ]).astype(jnp.float32)
            q2 = _quantize_tiled(x2, params, qmin=qmin, qmax=qmax,
                                 dequantize=self.dequantize, inplace=self.inplace)

        out = q2.reshape(-1)[:total] if padded else q2     # slice only if padded
        out = out.reshape(x.shape)                          # metadata-only reshape
        return out if orig_dtype == jnp.float32 else out.astype(orig_dtype)


# ---------------------------------------------------------------------------
# Pure-JAX reference (same arithmetic formulation as the kernels)
# ---------------------------------------------------------------------------
def _reference(x, num_bits):
    mn = jnp.min(x)
    mx = jnp.max(x)
    qmin, qmax = 0.0, 2.0 ** num_bits - 1.0
    scale = jnp.maximum((mx - mn) * (1.0 / (qmax - qmin)), 1e-8)
    inv_scale = 1.0 / scale
    q = jnp.round(jnp.clip((x + (qmin * scale - mn)) * inv_scale, qmin, qmax))
    return q * scale + (mn - qmin * scale)


if __name__ == "__main__":
    key = jax.random.PRNGKey(0)
    x = jax.random.normal(key, (2, 4, 16, 16), dtype=jnp.float32)  # NCHW
    num_bits = 8

    ref = _reference(x, num_bits)
    qmin, qmax = 0.0, 2.0 ** num_bits - 1.0

    # 1) Training mode -> fused single-pass (min/max + quantize) kernel,
    #    copy-free (rows, 128) view (2048 elems -> 16x128, no pad, no slice).
    qm = QuantMeasure()  # defaults: training mode, dequantize=True
    y = jax.block_until_ready(qm(x, num_bits))
    assert y.shape == x.shape and y.dtype == x.dtype
    assert jnp.allclose(y, ref, atol=1e-5, rtol=1e-5)

    # 2) Two-pass tiled path: multi-tile parallel/accumulating min/max kernel
    #    + SMEM-param elementwise quantize kernel.
    x2 = x.reshape(-1, _LANES)
    mn, mx = _global_min_max(x2, tile_m=8)        # 2 tiles
    mn, mx = jax.block_until_ready((mn, mx))
    assert bool(jnp.isclose(mn, jnp.min(x))) and bool(jnp.isclose(mx, jnp.max(x)))

    scale = jnp.maximum((mx - mn) * (1.0 / (qmax - qmin)), 1e-8)
    params = jnp.stack([1.0 / scale, qmin * scale - mn, scale,
                        mn - qmin * scale]).astype(jnp.float32)
    q2 = _quantize_tiled(x2, params, qmin=qmin, qmax=qmax, dequantize=True,
                         inplace=False, tile_m=8)
    q2 = jax.block_until_ready(q2)
    assert jnp.allclose(q2.reshape(x.shape), ref, atol=1e-5, rtol=1e-5)

    # 3) Eval mode (running stats) -> tiled SMEM-param quantize via the module.
    qm_eval = QuantMeasure()
    qm_eval.training = False
    qm_eval.running_zero_point = jnp.reshape(mn, (1,))
    qm_eval.running_range = jnp.reshape(mx - mn, (1,))
    y2 = jax.block_until_ready(qm_eval(x, num_bits))
    assert jnp.allclose(y2, ref, atol=1e-5, rtol=1e-5)

    print("KERNEL_OK")
</pallas_src>

<mosaic_0001>
module attributes {stable_mosaic.version = 11 : i64} {
  func.func @_fused_minmax_quantize_kernel(%arg0: memref<16x128xf32, #tpu.memory_space<vmem>>, %arg1: memref<16x128xf32, #tpu.memory_space<vmem>>, %arg2: memref<1x1xf32, #tpu.memory_space<vmem>>, %arg3: memref<1x1xf32, #tpu.memory_space<vmem>>) attributes {dimension_semantics = [], scalar_prefetch = 0 : i64, scratch_operands = 0 : i64, tpu.core_type = #tpu.core_type<tc>} {
    %c0 = arith.constant 0 : index
    %c0_0 = arith.constant 0 : index
    %0 = vector.load %arg0[%c0, %c0_0] : memref<16x128xf32, #tpu.memory_space<vmem>>, vector<16x128xf32>
    %1 = vector.shape_cast %0 : vector<16x128xf32> to vector<1x16x128xf32>
    %cst = arith.constant dense<0x7F800000> : vector<1xf32>
    %2 = vector.multi_reduction <minimumf>, %1, %cst [1, 2] : vector<1x16x128xf32> to vector<1xf32>
    %3 = vector.shape_cast %2 : vector<1xf32> to vector<1x1x1xf32>
    %4 = vector.extract %3[0, 0, 0] : f32 from vector<1x1x1xf32>
    %5 = vector.broadcast %4 : f32 to vector<1x1xf32>
    %6 = vector.shape_cast %0 : vector<16x128xf32> to vector<1x16x128xf32>
    %cst_1 = arith.constant dense<0xFF800000> : vector<1xf32>
    %7 = vector.multi_reduction <maximumf>, %6, %cst_1 [1, 2] : vector<1x16x128xf32> to vector<1xf32>
    %8 = vector.shape_cast %7 : vector<1xf32> to vector<1x1x1xf32>
    %9 = vector.extract %8[0, 0, 0] : f32 from vector<1x1x1xf32>
    %10 = vector.broadcast %9 : f32 to vector<1x1xf32>
    %11 = arith.subf %10, %5 : vector<1x1xf32>
    %cst_2 = arith.constant 0.00392156886 : f32
    %12 = vector.broadcast %cst_2 : f32 to vector<1x1xf32>
    %13 = arith.mulf %11, %12 : vector<1x1xf32>
    %cst_3 = arith.constant 9.99999993E-9 : f32
    %14 = vector.broadcast %cst_3 : f32 to vector<1x1xf32>
    %15 = arith.maximumf %13, %14 : vector<1x1xf32>
    %cst_4 = arith.constant 1.000000e+00 : f32
    %16 = vector.broadcast %cst_4 : f32 to vector<1x1xf32>
    %17 = arith.divf %16, %15 : vector<1x1xf32>
    %cst_5 = arith.constant 0.000000e+00 : f32
    %18 = vector.broadcast %cst_5 : f32 to vector<1x1xf32>
    %19 = arith.mulf %18, %15 : vector<1x1xf32>
    %20 = arith.subf %19, %5 : vector<1x1xf32>
    %21 = vector.broadcast %20 : vector<1x1xf32> to vector<16x128xf32>
    %22 = arith.addf %0, %21 : vector<16x128xf32>
    %23 = vector.broadcast %17 : vector<1x1xf32> to vector<16x128xf32>
    %24 = arith.mulf %22, %23 : vector<16x128xf32>
    %cst_6 = arith.constant 0.000000e+00 : f32
    %cst_7 = arith.constant 2.550000e+02 : f32
    %25 = vector.broadcast %cst_6 : f32 to vector<16x128xf32>
    %26 = arith.maximumf %25, %24 : vector<16x128xf32>
    %27 = vector.broadcast %cst_7 : f32 to vector<16x128xf32>
    %28 = arith.minimumf %27, %26 : vector<16x128xf32>
    %29 = math.roundeven %28 : vector<16x128xf32>
    %30 = vector.broadcast %15 : vector<1x1xf32> to vector<16x128xf32>
    %31 = arith.mulf %29, %30 : vector<16x128xf32>
    %cst_8 = arith.constant 0.000000e+00 : f32
    %32 = vector.broadcast %cst_8 : f32 to vector<1x1xf32>
    %33 = arith.mulf %32, %15 : vector<1x1xf32>
    %34 = arith.subf %5, %33 : vector<1x1xf32>
    %35 = vector.broadcast %34 : vector<1x1xf32> to vector<16x128xf32>
    %36 = arith.addf %31, %35 : vector<16x128xf32>
    %c0_9 = arith.constant 0 : index
    %c0_10 = arith.constant 0 : index
    %37 = vector.load %arg1[%c0_9, %c0_10] : memref<16x128xf32, #tpu.memory_space<vmem>>, vector<16x128xf32>
    tpu.vector_store %arg1[%c0_9, %c0_10], %36 {strides = array<i32>} : memref<16x128xf32, #tpu.memory_space<vmem>>, vector<16x128xf32>,
    %c0_11 = arith.constant 0 : index
    %c0_12 = arith.constant 0 : index
    %38 = vector.load %arg2[%c0_11, %c0_12] : memref<1x1xf32, #tpu.memory_space<vmem>>, vector<1x1xf32>
    tpu.vector_store %arg2[%c0_11, %c0_12], %5 {strides = array<i32>} : memref<1x1xf32, #tpu.memory_space<vmem>>, vector<1x1xf32>,
    %c0_13 = arith.constant 0 : index
    %c0_14 = arith.constant 0 : index
    %39 = vector.load %arg3[%c0_13, %c0_14] : memref<1x1xf32, #tpu.memory_space<vmem>>, vector<1x1xf32>
    tpu.vector_store %arg3[%c0_13, %c0_14], %10 {strides = array<i32>} : memref<1x1xf32, #tpu.memory_space<vmem>>, vector<1x1xf32>,
    return
  }
}

</mosaic_0001>

<bundles_post_ra>
// kernel: tpu_custom_call.1
= control target key start
LH: loop header
LB: loop body
LE: loop exit
PB: predicated region body
PF: predicated region fallthrough
CT: control target
= control target key end

     0   :  { %9 = vsyncpa [#allocation3], 0  ;;  %s322_s0 = inlined_call_operand.hbm [shape: f32[16,128], index: 0, kind: input, shape index: {}]   ;;  %s323_s1 = inlined_call_operand.hbm [shape: f32[16,128], index: 1, kind: output, shape index: {0}]   ;;  %s324_s2 = inlined_call_operand.hbm [shape: f32[1,1], index: 2, kind: output, shape index: {1}]   ;;  %s325_s3 = inlined_call_operand.hbm [shape: f32[1,1], index: 3, kind: output, shape index: {2}]  }
   0x1   :  { %10 = vsyncpa [#allocation4], 0 }
   0x2   :  { %11 = vsyncpa [#allocation7], 0  ;;  %s230_s12 = smov [#allocation2]   ;;  %s136_s16 = scalar_lea.hbm %s322_s0, 256 }
   0x3   :  { %s17_s13 = sshll.u32 %s230_s12, 4  ;;  %p137_p0 = scmp.ne.s32.totalorder %s322_s0, %s136_s16  ;;  %s18_s13 = int_to_ptr.vmem [resolvable:$true] %s17_s13 }
   0x4   :  { %p140_p1 = scmp.lt.u32.totalorder %s136_s16, %s322_s0 }
   0x6   :  { %p142_p2 = pnand %p140_p1, %p137_p0 }
   0x8   :  { %145 = shalt.err (!%p142_p2)
}
   0x9   :  { %s146_s21 = scalar_lea.vmem %s18_s13, 256  ;;  %p151_p4 = scmp.lt.s32.totalorder %s18_s13, %s18_s13 }
   0xa   :  { %p147_p3 = scmp.ne.s32.totalorder %s18_s13, %s146_s21  ;;  %p152_p5 = scmp.lt.s32.totalorder %s146_s21, %s146_s21 }
   0xc   :  { %p153_p6 = por %p152_p5, %p151_p4 }
   0xe   :  { %p154_p7 = pnand %p153_p6, %p147_p3 }
  0x10   :  { %157 = shalt.err (!%p154_p7)
}
  0x11   :  { %s231_s22 = smov 128   ;;  %s232_s23 = smov 8  }
  0x12   :  { %23 = dma.hbm_to_vmem [thread:$0]  %s322_s0, 256, %s18_s13, [#allocation3], %s231_s22, %s231_s22, %s232_s23  }
  0x13   :  { %224 = dma.done.wait [#allocation3], 256  }
  0x14   :  { %225 = vsyncadd [#allocation3], 4294967040  ;;  %v271_v0 = vld [vmem:[#allocation2] sm:$0xff]  ;;  %v273_v1 = vld [vmem:[#allocation2 + $0x8] sm:$0xff]  ;;  %s233_s0 = smov [#allocation6]   ;;  %vm75_vm0 = vcmask 0  }
  0x15   :  { %v29_v2 = vmin.f32 %v271_v0, %v273_v1  ;;  %v40_v3 = vmax.f32 %v271_v0, %v273_v1  ;;  %s96_s26 = sshll.u32 %s233_s0, 4  ;;  %s234_s28 = smov [#allocation8]   ;;  %s97_s26 = int_to_ptr.vmem [resolvable:$true] %s96_s26 }
  0x16   :  { %s106_s29 = sshll.u32 %s234_s28, 4  ;;  %s158_s30 = scalar_lea.vmem %s97_s26, 16  ;;  %s107_s29 = int_to_ptr.vmem [resolvable:$true] %s106_s29 }
  0x17   :  { %30 = vmin.xlane.f32.xlu0 %v29_v2  ;;  %p159_p8 = scmp.ne.s32.totalorder %s97_s26, %s158_s30  ;;  %s162_s4 = scalar_lea.vmem %s97_s26, 32 }
  0x18   :  { %p163_p9 = scmp.lt.s32.totalorder %s97_s26, %s97_s26  ;;  %p164_p10 = scmp.lt.s32.totalorder %s162_s4, %s158_s30 }
  0x1a   :  { %p165_p11 = por %p164_p10, %p163_p9 }
  0x1b   :  { %41 = vmax.xlane.f32.xlu0 %v40_v3 }
  0x1c   :  { %p166_p12 = pnand %p165_p11, %p159_p8 }
  0xa4   :  { %v31_v4 = vpop.xlane.xlu0 %30 }
  0xa5   :  { %v32_v5 = vrot.slane %v31_v4, 4 }
  0xa7   :  { %v33_v6 = vmin.f32 %v31_v4, %v32_v5 }
  0xa8   :  { %v42_v7 = vpop.xlane.xlu0 %41 }
  0xa9   :  { %v34_v8 = vrot.slane %v33_v6, 2  ;;  %v43_v9 = vrot.slane %v42_v7, 4 }
  0xab   :  { %v44_v10 = vmax.f32 %v42_v7, %v43_v9  ;;  %v35_v11 = vmin.f32 %v33_v6, %v34_v8 }
  0xad   :  { %v45_v12 = vrot.slane %v44_v10, 2  ;;  %v36_v13 = vrot.slane %v35_v11, 1 }
  0xaf   :  { %v46_v14 = vmax.f32 %v44_v10, %v45_v12  ;;  %v37_v15 = vmin.f32 %v35_v11, %v36_v13 }
  0xb1   :  { %122 = vpush %v37_v15  ;;  %v47_v16 = vrot.slane %v46_v14, 1 }
  0xb3   :  { %v48_v17 = vmax.f32 %v46_v14, %v47_v16 }
  0xb5   :  { %124 = vpush %v48_v17 }
  0xe2   :  { %s123_s27 = spop %122 }
  0xe3   :  { %v39_v18 = vstv %s123_s27 }
  0xe4   :  { %76 = vst.msk [vmem:[#allocation6] sm:$0x1] %vm75_vm0, %v39_v18 }
  0xe5   :  { %169 = shalt.err (!%p166_p12)
}
  0xe6   :  { %s170_s7 = scalar_lea.hbm %s324_s2, 16 }
  0xe7   :  { %p171_p13 = scmp.ne.s32.totalorder %s324_s2, %s170_s7  ;;  %p174_p0 = scmp.lt.u32.totalorder %s170_s7, %s324_s2 }
  0xe9   :  { %p176_p1 = pnand %p174_p0, %p171_p13 }
  0xeb   :  { %179 = shalt.err (!%p176_p1)
}
  0xec   :  { %99 = dma.vmem_to_hbm [thread:$0]  %s97_s26, 16, %s324_s2, [#allocation7]  }
  0xed   :  { %s125_s14 = spop %124  ;;  %s180_s15 = scalar_lea.vmem %s107_s29, 16 }
  0xee   :  { %v50_v19 = vstv %s125_s14  ;;  %p181_p2 = scmp.ne.s32.totalorder %s107_s29, %s180_s15  ;;  %s184_s16 = scalar_lea.vmem %s107_s29, 32 }
  0xef   :  { %v51_v20 = vsub.f32 %v50_v19, %v39_v18  ;;  %77 = vst.msk [vmem:[#allocation8] sm:$0x1] %vm75_vm0, %v50_v19  ;;  %p185_p3 = scmp.lt.s32.totalorder %s107_s29, %s107_s29  ;;  %p186_p4 = scmp.lt.s32.totalorder %s184_s16, %s180_s15 }
  0xf1   :  { %p187_p5 = por %p186_p4, %p185_p3 }
  0xf3   :  { %p188_p6 = pnand %p187_p5, %p181_p2 }
  0xf5   :  { %191 = shalt.err (!%p188_p6)
}
  0xf6   :  { %s192_s19 = scalar_lea.hbm %s325_s3, 16 }
  0xf7   :  { %p193_p7 = scmp.ne.s32.totalorder %s325_s3, %s192_s19  ;;  %p196_p8 = scmp.lt.u32.totalorder %s192_s19, %s325_s3 }
  0xf9   :  { %p198_p9 = pnand %p196_p8, %p193_p7 }
  0xfb   :  { %201 = shalt.err (!%p198_p9)
}
  0xfc   :  { %109 = dma.vmem_to_hbm [thread:$0]  %s107_s29, 16, %s325_s3, [#allocation7]   ;;  %v52_v21 = vmul.f32 0.003921569, %v51_v20 }
  0xfd   :  { %s235_s26 = smov [#allocation5]  }
  0xfe   :  { %v53_v22 = vmax.f32 %v52_v21, 1e-08  ;;  %s83_s3 = sshll.u32 %s235_s26, 4  ;;  %s84_s3 = int_to_ptr.vmem [resolvable:$true] %s83_s3 }
  0xff   :  { %s202_s27 = scalar_lea.vmem %s84_s3, 256  ;;  %p207_p11 = scmp.lt.s32.totalorder %s84_s3, %s84_s3 }
 0x100   :  { %134 = vrcp.f32 %v53_v22  ;;  %v56_v23 = vmul.f32 0.0, %v53_v22  ;;  %p203_p10 = scmp.ne.s32.totalorder %s84_s3, %s202_s27  ;;  %p208_p12 = scmp.lt.s32.totalorder %s202_s27, %s202_s27 }
 0x102   :  { %v57_v24 = vsub.f32 %v56_v23, %v39_v18  ;;  %v70_v38 = vsub.f32 %v39_v18, %v56_v23  ;;  %p209_p13 = por %p208_p12, %p207_p11 }
 0x104   :  { %v58_v25 = vadd.f32 %v57_v24, %v271_v0  ;;  %v59_v26 = vadd.f32 %v57_v24, %v273_v1  ;;  %p210_p0 = pnand %p209_p13, %p203_p10 }
 0x10a   :  { %v135_v27 = vpop.eup %134 }
 0x10b   :  { %v60_v28 = vmul.f32 %v135_v27, %v58_v25  ;;  %v61_v29 = vmul.f32 %v135_v27, %v59_v26 }
 0x10d   :  { %v62_v30 = vmax.f32 %v60_v28, 0.0  ;;  %v63_v31 = vmax.f32 %v61_v29, 0.0 }
 0x10f   :  { %v64_v32 = vmin.f32 %v62_v30, 255.0  ;;  %v65_v33 = vmin.f32 %v63_v31, 255.0 }
 0x111   :  { %v126_v34 = vround.rtne.f32 %v64_v32  ;;  %v127_v35 = vround.rtne.f32 %v65_v33 }
 0x113   :  { %v68_v36 = vmul.f32 %v126_v34, %v53_v22  ;;  %v69_v37 = vmul.f32 %v127_v35, %v53_v22 }
 0x115   :  { %v71_v39 = vadd.f32 %v70_v38, %v68_v36  ;;  %v72_v40 = vadd.f32 %v70_v38, %v69_v37 }
 0x117   :  { %73 = vst [vmem:[#allocation5] sm:$0xff] %v71_v39  ;;  %74 = vst [vmem:[#allocation5 + $0x8] sm:$0xff] %v72_v40 }
 0x118   :  { %213 = shalt.err (!%p210_p0)
}
 0x119   :  { %s214_s30 = scalar_lea.hbm %s323_s1, 256 }
 0x11a   :  { %p215_p1 = scmp.ne.s32.totalorder %s323_s1, %s214_s30  ;;  %p218_p2 = scmp.lt.u32.totalorder %s214_s30, %s323_s1 }
 0x11c   :  { %p220_p3 = pnand %p218_p2, %p215_p1 }
 0x11e   :  { %223 = shalt.err (!%p220_p3)
}
 0x11f   :  { %89 = dma.vmem_to_hbm [thread:$0]  %s84_s3, 256, %s323_s1, [#allocation4], %s231_s22, %s231_s22, %s232_s23  }
 0x120   :  { %226 = dma.done.wait [#allocation4], 256  }
 0x121   :  { %227 = vsyncadd [#allocation4], 4294967040 }
 0x122   :  { %228 = dma.done.wait [#allocation7], 32  }
 0x123   :  { %229 = vsyncadd [#allocation7], 4294967264 }
 0x124   :  { %119 = vsyncpa [#allocation3], 1 }
 0x125   :  { %120 = vsyncpa [#allocation4], 1 }
 0x126   :  { %121 = vsyncpa [#allocation7], 1 }

</bundles_post_ra>
